<compile_context>
chip_gen: v6e
topology: v6e:2x2x1
jax: 0.10.0
libtpu: 0.0.40
codegen_flags: <defaults>
</compile_context>

<pallas_src>
import functools

import jax
import jax.numpy as jnp
from jax.experimental import pallas as pl
from jax.experimental.pallas import tpu as pltpu


def _round_up(x, m):
    return (x + m - 1) // m * m


def _mlp_fused_kernel(*refs, num_layers, compute_dtype):
    """Fused MLP on one tile of rows; all layer weights are resident in VMEM.

    refs = (x_ref, w0_ref, b0_ref, ..., w{L-1}_ref, b{L-1}_ref, o_ref)
      x_ref: (tm, K0) activation row tile
      wi_ref: (Ki, Ni) full weight matrix (in, out), compute dtype
      bi_ref: (1, Ni)  bias row, f32
      o_ref: (tm, N_last) output tile
    """
    x_ref = refs[0]
    o_ref = refs[1 + 2 * num_layers]

    h = x_ref[...]
    for i in range(num_layers):
        w_ref = refs[1 + 2 * i]
        b_ref = refs[2 + 2 * i]
        # MXU matmul in compute_dtype (bf16 by default), f32 accumulation.
        y = jnp.dot(h.astype(compute_dtype), w_ref[...],
                    preferred_element_type=jnp.float32)
        y = y + b_ref[...]                     # bias + ReLU in f32 on the VPU
        if i < num_layers - 1:
            y = jnp.maximum(y, 0.0)
        h = y
    o_ref[...] = h.astype(o_ref.dtype)


def mlp_forward(x, params, *, tm=256, compute_dtype=jnp.bfloat16):
    """Pallas MLP: ReLU(linear) for all but the last layer, plain linear last.

    x: (..., input_dim)
    params: list of (W, b) with W of shape (in_features, out_features)
            (transpose of PyTorch nn.Linear weight layout).
    """
    lead_shape = x.shape[:-1]
    in_dim = x.shape[-1]
    h = x.reshape(-1, in_dim)
    M = h.shape[0]
    num_layers = len(params)
    out_dim = params[-1][0].shape[1]

    # Row tile: large enough to feed the MXU; pad M instead of asserting.
    tm = min(tm, _round_up(M, 8))
    m_pad = _round_up(M, tm)
    if m_pad != M:
        h = jnp.pad(h, ((0, m_pad - M), (0, 0)))

    flat_args = [h]
    in_specs = [pl.BlockSpec((tm, in_dim), lambda i: (i, 0))]
    weight_bytes = 0
    flops = 0
    for w, b in params:
        k, n = w.shape
        wc = w.astype(compute_dtype)           # halves weight HBM bytes (bf16)
        flat_args += [wc, b.reshape(1, n).astype(jnp.float32)]
        in_specs += [
            pl.BlockSpec((k, n), lambda i: (0, 0)),   # weight resident in VMEM
            pl.BlockSpec((1, n), lambda i: (0, 0)),   # bias resident in VMEM
        ]
        weight_bytes += wc.size * wc.dtype.itemsize + n * 4
        flops += 2 * m_pad * k * n

    # VMEM budget: resident weights + double-buffered activation/output tiles.
    # TODO(synk): tile the N/K axes instead of keeping full weights resident if
    # a layer's weight matrix no longer fits in VMEM (not needed for DETR heads).
    tile_bytes = 2 * (tm * in_dim + tm * out_dim) * h.dtype.itemsize
    est_vmem = weight_bytes + tile_bytes
    vmem_limit = int(min(64 * 1024 * 1024, max(32 * 1024 * 1024, 4 * est_vmem)))

    io_bytes = (h.size * h.dtype.itemsize
                + weight_bytes
                + m_pad * out_dim * h.dtype.itemsize)

    kernel = functools.partial(_mlp_fused_kernel,
                               num_layers=num_layers,
                               compute_dtype=compute_dtype)
    out = pl.pallas_call(
        kernel,
        out_shape=jax.ShapeDtypeStruct((m_pad, out_dim), x.dtype),
        grid_spec=pltpu.PrefetchScalarGridSpec(
            num_scalar_prefetch=0,
            grid=(m_pad // tm,),
            in_specs=in_specs,
            out_specs=pl.BlockSpec((tm, out_dim), lambda i: (i, 0)),
        ),
        compiler_params=pltpu.CompilerParams(
            dimension_semantics=("parallel",),
            vmem_limit_bytes=vmem_limit,
        ),
        cost_estimate=pl.CostEstimate(
            flops=flops, transcendentals=0, bytes_accessed=io_bytes),
    )(*flat_args)

    out = out[:M]
    return out.reshape(*lead_shape, out_dim)


def init_mlp_params(key, input_dim, hidden_dim, output_dim, num_layers):
    """Deterministic synthetic init matching nn.Linear shapes.

    PyTorch nn.Linear(n, k) has weight (k, n) and bias (k,); we store the
    transpose (n, k) so the kernel computes x @ W directly.
    """
    hs = [hidden_dim] * (num_layers - 1)
    dims_in = [input_dim] + hs
    dims_out = hs + [output_dim]
    params = []
    for n, k in zip(dims_in, dims_out):
        key, kw, kb = jax.random.split(key, 3)
        bound = 1.0 / (n ** 0.5)
        w = jax.random.uniform(kw, (n, k), jnp.float32, -bound, bound)
        b = jax.random.uniform(kb, (k,), jnp.float32, -bound, bound)
        params.append((w, b))
    return params


def mlp_reference(x, params):
    """Plain-JAX f32 reference for correctness checking."""
    h = x
    num_layers = len(params)
    for i, (w, b) in enumerate(params):
        h = h @ w + b
        if i < num_layers - 1:
            h = jnp.maximum(h, 0.0)
    return h


if __name__ == "__main__":
    # Small shapes consistent with the module: (batch, seq, input_dim) tokens.
    batch, seq = 2, 8
    input_dim, hidden_dim, output_dim, num_layers = 32, 32, 4, 3

    key = jax.random.PRNGKey(0)
    key, kx = jax.random.split(key)
    x = jax.random.normal(kx, (batch, seq, input_dim), jnp.float32)
    params = init_mlp_params(key, input_dim, hidden_dim, output_dim, num_layers)

    ref = mlp_reference(x, params)

    # Default path: bf16 MXU inputs, f32 accumulation -> looser tolerance.
    out = jax.block_until_ready(mlp_forward(x, params))
    assert out.shape == (batch, seq, output_dim), out.shape
    assert jnp.allclose(out, ref, atol=5e-2, rtol=5e-2), "bf16 path mismatch"

    # Exact f32 compute path: tight tolerance against the reference.
    out_f32 = jax.block_until_ready(
        mlp_forward(x, params, compute_dtype=jnp.float32))
    assert jnp.allclose(out_f32, ref, atol=1e-5, rtol=1e-5), "f32 path mismatch"

    print("KERNEL_OK")
</pallas_src>

<mosaic_0001>
module attributes {stable_mosaic.version = 11 : i64} {
  func.func @_mlp_fused_kernel(%arg0: i32, %arg1: memref<16x32xf32, #tpu.memory_space<vmem>>, %arg2: memref<32x32xbf16, #tpu.memory_space<vmem>>, %arg3: memref<1x32xf32, #tpu.memory_space<vmem>>, %arg4: memref<32x32xbf16, #tpu.memory_space<vmem>>, %arg5: memref<1x32xf32, #tpu.memory_space<vmem>>, %arg6: memref<32x4xbf16, #tpu.memory_space<vmem>>, %arg7: memref<1x4xf32, #tpu.memory_space<vmem>>, %arg8: memref<16x4xf32, #tpu.memory_space<vmem>>) attributes {dimension_semantics = [#tpu.dimension_semantics<parallel>], iteration_bounds = array<i64: 1>, scalar_prefetch = 0 : i64, scratch_operands = 0 : i64, tpu.core_type = #tpu.core_type<tc>, window_params = [{transform_indices = @transform_0, window_bounds = array<i64: 16, 32>}, {pipeline_mode = #tpu.pipeline_mode<synchronous>, transform_indices = @transform_1, window_bounds = array<i64: 32, 32>}, {pipeline_mode = #tpu.pipeline_mode<synchronous>, transform_indices = @transform_2, window_bounds = array<i64: 1, 32>}, {pipeline_mode = #tpu.pipeline_mode<synchronous>, transform_indices = @transform_3, window_bounds = array<i64: 32, 32>}, {pipeline_mode = #tpu.pipeline_mode<synchronous>, transform_indices = @transform_4, window_bounds = array<i64: 1, 32>}, {pipeline_mode = #tpu.pipeline_mode<synchronous>, transform_indices = @transform_5, window_bounds = array<i64: 32, 4>}, {pipeline_mode = #tpu.pipeline_mode<synchronous>, transform_indices = @transform_6, window_bounds = array<i64: 1, 4>}, {transform_indices = @transform_7, window_bounds = array<i64: 16, 4>}]} {
    %c0 = arith.constant 0 : index
    %c0_0 = arith.constant 0 : index
    %0 = vector.load %arg1[%c0, %c0_0] : memref<16x32xf32, #tpu.memory_space<vmem>>, vector<16x32xf32>
    %1 = arith.truncf %0 : vector<16x32xf32> to vector<16x32xbf16>
    %c0_1 = arith.constant 0 : index
    %c0_2 = arith.constant 0 : index
    %2 = vector.load %arg2[%c0_1, %c0_2] : memref<32x32xbf16, #tpu.memory_space<vmem>>, vector<32x32xbf16>
    %cst = arith.constant dense<0.000000e+00> : vector<16x32xf32>
    %3 = tpu.matmul %1, %2, %cst {dimension_numbers = #tpu.dot_dimension_numbers<[1], [0], [0], [1], [0, 0, 1, 1], [], []>} : vector<16x32xbf16>, vector<32x32xbf16>, vector<16x32xf32> -> vector<16x32xf32>
    %c0_3 = arith.constant 0 : index
    %c0_4 = arith.constant 0 : index
    %4 = vector.load %arg3[%c0_3, %c0_4] : memref<1x32xf32, #tpu.memory_space<vmem>>, vector<1x32xf32>
    %5 = vector.broadcast %4 : vector<1x32xf32> to vector<16x32xf32>
    %6 = arith.addf %3, %5 : vector<16x32xf32>
    %cst_5 = arith.constant 0.000000e+00 : f32
    %7 = vector.broadcast %cst_5 : f32 to vector<16x32xf32>
    %8 = arith.maximumf %6, %7 : vector<16x32xf32>
    %9 = arith.truncf %8 : vector<16x32xf32> to vector<16x32xbf16>
    %c0_6 = arith.constant 0 : index
    %c0_7 = arith.constant 0 : index
    %10 = vector.load %arg4[%c0_6, %c0_7] : memref<32x32xbf16, #tpu.memory_space<vmem>>, vector<32x32xbf16>
    %cst_8 = arith.constant dense<0.000000e+00> : vector<16x32xf32>
    %11 = tpu.matmul %9, %10, %cst_8 {dimension_numbers = #tpu.dot_dimension_numbers<[1], [0], [0], [1], [0, 0, 1, 1], [], []>} : vector<16x32xbf16>, vector<32x32xbf16>, vector<16x32xf32> -> vector<16x32xf32>
    %c0_9 = arith.constant 0 : index
    %c0_10 = arith.constant 0 : index
    %12 = vector.load %arg5[%c0_9, %c0_10] : memref<1x32xf32, #tpu.memory_space<vmem>>, vector<1x32xf32>
    %13 = vector.broadcast %12 : vector<1x32xf32> to vector<16x32xf32>
    %14 = arith.addf %11, %13 : vector<16x32xf32>
    %cst_11 = arith.constant 0.000000e+00 : f32
    %15 = vector.broadcast %cst_11 : f32 to vector<16x32xf32>
    %16 = arith.maximumf %14, %15 : vector<16x32xf32>
    %17 = arith.truncf %16 : vector<16x32xf32> to vector<16x32xbf16>
    %c0_12 = arith.constant 0 : index
    %c0_13 = arith.constant 0 : index
    %18 = vector.load %arg6[%c0_12, %c0_13] : memref<32x4xbf16, #tpu.memory_space<vmem>>, vector<32x4xbf16>
    %cst_14 = arith.constant dense<0.000000e+00> : vector<16x4xf32>
    %19 = tpu.matmul %17, %18, %cst_14 {dimension_numbers = #tpu.dot_dimension_numbers<[1], [0], [0], [1], [0, 0, 1, 1], [], []>} : vector<16x32xbf16>, vector<32x4xbf16>, vector<16x4xf32> -> vector<16x4xf32>
    %c0_15 = arith.constant 0 : index
    %c0_16 = arith.constant 0 : index
    %20 = vector.load %arg7[%c0_15, %c0_16] : memref<1x4xf32, #tpu.memory_space<vmem>>, vector<1x4xf32>
    %21 = vector.broadcast %20 : vector<1x4xf32> to vector<16x4xf32>
    %22 = arith.addf %19, %21 : vector<16x4xf32>
    %c0_17 = arith.constant 0 : index
    %c0_18 = arith.constant 0 : index
    %23 = vector.load %arg8[%c0_17, %c0_18] : memref<16x4xf32, #tpu.memory_space<vmem>>, vector<16x4xf32>
    tpu.vector_store %arg8[%c0_17, %c0_18], %22 {strides = array<i32>} : memref<16x4xf32, #tpu.memory_space<vmem>>, vector<16x4xf32>,
    return
  }
  func.func @transform_0(%arg0: i32) -> (i32, i32) {
    %c0_i32 = arith.constant 0 : i32
    %c0_i32_0 = arith.constant 0 : i32
    return %arg0, %c0_i32 : i32, i32
  }
  func.func @transform_1(%arg0: i32) -> (i32, i32) {
    %c0_i32 = arith.constant 0 : i32
    %c0_i32_0 = arith.constant 0 : i32
    %c0_i32_1 = arith.constant 0 : i32
    return %c0_i32, %c0_i32_0 : i32, i32
  }
  func.func @transform_2(%arg0: i32) -> (i32, i32) {
    %c0_i32 = arith.constant 0 : i32
    %c0_i32_0 = arith.constant 0 : i32
    %c0_i32_1 = arith.constant 0 : i32
    return %c0_i32, %c0_i32_0 : i32, i32
  }
  func.func @transform_3(%arg0: i32) -> (i32, i32) {
    %c0_i32 = arith.constant 0 : i32
    %c0_i32_0 = arith.constant 0 : i32
    %c0_i32_1 = arith.constant 0 : i32
    return %c0_i32, %c0_i32_0 : i32, i32
  }
  func.func @transform_4(%arg0: i32) -> (i32, i32) {
    %c0_i32 = arith.constant 0 : i32
    %c0_i32_0 = arith.constant 0 : i32
    %c0_i32_1 = arith.constant 0 : i32
    return %c0_i32, %c0_i32_0 : i32, i32
  }
  func.func @transform_5(%arg0: i32) -> (i32, i32) {
    %c0_i32 = arith.constant 0 : i32
    %c0_i32_0 = arith.constant 0 : i32
    %c0_i32_1 = arith.constant 0 : i32
    return %c0_i32, %c0_i32_0 : i32, i32
  }
  func.func @transform_6(%arg0: i32) -> (i32, i32) {
    %c0_i32 = arith.constant 0 : i32
    %c0_i32_0 = arith.constant 0 : i32
    %c0_i32_1 = arith.constant 0 : i32
    return %c0_i32, %c0_i32_0 : i32, i32
  }
  func.func @transform_7(%arg0: i32) -> (i32, i32) {
    %c0_i32 = arith.constant 0 : i32
    %c0_i32_0 = arith.constant 0 : i32
    return %arg0, %c0_i32 : i32, i32
  }
}

</mosaic_0001>

<bundles_post_ra>
// kernel: tpu_custom_call.1
= control target key start
LH: loop header
LB: loop body
LE: loop exit
PB: predicated region body
PF: predicated region fallthrough
CT: control target
= control target key end

     0   :  { %12 = vsyncpa [#allocation3], 0  ;;  %s458_s0 = inlined_call_operand.vmem [shape: f32[16,32], index: 0, kind: input, shape index: {}]   ;;  %s459_s1 = inlined_call_operand.hbm [shape: bf16[32,32], index: 1, kind: input, shape index: {}]   ;;  %s460_s2 = inlined_call_operand.vmem [shape: f32[1,32], index: 2, kind: input, shape index: {}]   ;;  %s461_s3 = inlined_call_operand.hbm [shape: bf16[32,32], index: 3, kind: input, shape index: {}]   ;;  %s462_s4 = inlined_call_operand.vmem [shape: f32[1,32], index: 4, kind: input, shape index: {}]   ;;  %s463_s5 = inlined_call_operand.vmem [shape: bf16[32,4], index: 5, kind: input, shape index: {}]   ;;  %s464_s6 = inlined_call_operand.vmem [shape: f32[1,4], index: 6, kind: input, shape index: {}]   ;;  %s465_s7 = inlined_call_operand.vmem [shape: f32[16,4], index: 7, kind: output, shape index: {}]  }
   0x1   :  { %13 = vsyncpa [#allocation5], 0  ;;  %s376_s24 = smov [#allocation2]  }
   0x2   :  { %s21_s25 = sshll.u32 %s376_s24, 4  ;;  %s22_s25 = int_to_ptr.vmem [resolvable:$true] %s21_s25 }
   0x3   :  { %s340_s26 = scalar_lea.vmem %s22_s25, 256  ;;  %p345_p1 = scmp.lt.s32.totalorder %s22_s25, %s22_s25 }
   0x4   :  { %p341_p0 = scmp.ne.s32.totalorder %s22_s25, %s340_s26  ;;  %p346_p2 = scmp.lt.s32.totalorder %s340_s26, %s340_s26 }
   0x6   :  { %p347_p3 = por %p346_p2, %p345_p1 }
   0x8   :  { %p348_p4 = pnand %p347_p3, %p341_p0 }
   0xa   :  { %351 = shalt.err (!%p348_p4)
}
   0xb   :  { %s377_s27 = smov 64   ;;  %s378_s28 = smov 4  }
   0xc   :  { %27 = dma.hbm_to_vmem [thread:$0]  %s459_s1, 256, %s22_s25, [#allocation3], %s377_s27, %s377_s27, %s378_s28  }
   0xd   :  { %s379_s8 = smov [#allocation4]  }
   0xe   :  { %s35_s9 = sshll.u32 %s379_s8, 4  ;;  %s36_s9 = int_to_ptr.vmem [resolvable:$true] %s35_s9 }
   0xf   :  { %s360_s10 = scalar_lea.vmem %s36_s9, 256  ;;  %p365_p6 = scmp.lt.s32.totalorder %s36_s9, %s36_s9 }
  0x10   :  { %p361_p5 = scmp.ne.s32.totalorder %s36_s9, %s360_s10  ;;  %p366_p7 = scmp.lt.s32.totalorder %s360_s10, %s360_s10 }
  0x12   :  { %p367_p8 = por %p366_p7, %p365_p6 }
  0x14   :  { %p368_p9 = pnand %p367_p8, %p361_p5 }
  0x16   :  { %371 = shalt.err (!%p368_p9)
}
  0x17   :  { %41 = dma.hbm_to_vmem [thread:$0]  %s461_s3, 256, %s36_s9, [#allocation5], %s377_s27, %s377_s27, %s378_s28  }
  0x18   :  { %372 = dma.done.wait [#allocation3], 256  }
  0x19   :  { %373 = vsyncadd [#allocation3], 4294967040 }
  0x1a   :  { %374 = dma.done.wait [#allocation5], 256  }
  0x1b   :  { %375 = vsyncadd [#allocation5], 4294967040  ;;  %v380_v0 = vmov 0.0   ;;  %vm381_vm0 = vmmov 0   ;;  %v326_v1 = vld [vmem:[#allocation2 + $0x8] sm:$0xff]   ;;  %v327_v2 = vld [vmem:[#allocation2] sm:$0xff]  }
  0x1c   :  { %296 = vmatprep.subr.bf16.mxu0 %v380_v0  ;;  %300 = vmatprep.mubr.msk.bf16.mxu0 %vm381_vm0, %v380_v0  ;;  %v55_v3 = vld [vmem:[%s458_s0] sm:$0xff]  ;;  %v56_v4 = vld [vmem:[%s458_s0 + $0x8] sm:$0xff]  ;;  %vm81_vm1 = vcmask 261120   ;;  %v328_v6 = vld [vmem:[#allocation4 + $0x8] sm:$0xff]   ;;  %vm266_vm2 = vcmask 31744  }
  0x1d   :  { %304 = vmatprep.subr.bf16.mxu1 %v380_v0  ;;  %308 = vmatprep.mubr.msk.bf16.mxu1 %vm381_vm0, %v380_v0  ;;  %v57_v5 = vpack.c.bf16 %v56_v4, %v55_v3  ;;  %v329_v7 = vld [vmem:[#allocation4] sm:$0xff]   ;;  %v275_v8 = vld [vmem:[%s460_s2] ss:$0 sm:$0xff]  ;;  %v330_v18 = vld [vmem:[%s463_s5 + $0x8] sm:$0xff]  }
  0x1e   :  { %297 = vmatpush3.bf16.msra.mxu0 %v326_v1  ;;  %305 = vmatpush3.bf16.msra.mxu1 %v328_v6  ;;  %v331_v19 = vld [vmem:[%s463_s5] sm:$0xff]  }
  0x1f   :  { %298 = vmatprep.subr.bf16.mxu0 %v380_v0  ;;  %306 = vmatprep.subr.bf16.mxu1 %v380_v0  ;;  %v279_v20 = vld [vmem:[%s462_s4] ss:$0 sm:$0xff] }
  0x20   :  { %v283_v30 = vld [vmem:[%s464_s6] ss:$0 sm:$0xff] }
  0x22   :  { %299 = vmatpush3.bf16.msra.mxu0 %v327_v2  ;;  %307 = vmatpush3.bf16.msra.mxu1 %v329_v7 }
  0x23   :  { %312 = vmatprep.subr.bf16.mxu0 %v380_v0 }
  0x25   :  { %301 = vmatmul.mubr.msk.bf16.vlgmr.msra.gmra.mxu0 %vm81_vm1, %v57_v5 }
  0x26   :  { %316 = vmatprep.mubr.msk.bf16.mxu0 %vm381_vm0, %v380_v0  ;;  %313 = vmatpush3.bf16.msra.mxu0 %v330_v18 }
  0x27   :  { %314 = vmatprep.subr.bf16.mxu0 %v380_v0 }
  0x2a   :  { %315 = vmatpush3.bf16.msra.mxu0 %v331_v19 }
  0xe5   :  { %v119_v9 = vpop.f32.mrf.mxu0 }
  0xe6   :  { %v120_v11 = vadd.f32 %v275_v8, %v119_v9 }
  0xe7   :  { %v302_v10 = vpop.f32.mrf.mxu0 }
  0xe8   :  { %v126_v15 = vmax.f32 %v120_v11, 0.0 }
  0xe9   :  { %v122_v12 = vpop.f32.mrf.mxu0 }
  0xea   :  { %v123_v13 = vadd.f32 %v275_v8, %v122_v12 }
  0xeb   :  { %v303_v14 = vpop.f32.mrf.mxu0 }
  0xec   :  { %v127_v16 = vmax.f32 %v123_v13, 0.0 }
  0xee   :  { %v128_v17 = vpack.c.bf16 %v127_v16, %v126_v15 }
  0xf0   :  { %309 = vmatmul.mubr.msk.bf16.vlgmr.msra.gmra.mxu1 %vm81_vm1, %v128_v17 }
 0x1b0   :  { %v189_v21 = vpop.f32.mrf.mxu1 }
 0x1b1   :  { %v190_v23 = vadd.f32 %v279_v20, %v189_v21 }
 0x1b2   :  { %v310_v22 = vpop.f32.mrf.mxu1 }
 0x1b3   :  { %v196_v27 = vmax.f32 %v190_v23, 0.0 }
 0x1b4   :  { %v192_v24 = vpop.f32.mrf.mxu1 }
 0x1b5   :  { %v193_v25 = vadd.f32 %v279_v20, %v192_v24 }
 0x1b6   :  { %v311_v26 = vpop.f32.mrf.mxu1 }
 0x1b7   :  { %v197_v28 = vmax.f32 %v193_v25, 0.0 }
 0x1b9   :  { %v198_v29 = vpack.c.bf16 %v197_v28, %v196_v27 }
 0x1bb   :  { %317 = vmatmul.mubr.msk.bf16.vlgmr.msra.gmra.mxu0 %vm81_vm1, %v198_v29 }
 0x27b   :  { %v259_v31 = vpop.f32.mrf.mxu0 }
 0x27c   :  { %v260_v32 = vadd.f32 %v283_v30, %v259_v31 }
 0x27d   :  { %v318_v33 = vpop.f32.mrf.mxu0 }
 0x27e   :  { %267 = vst.msk [vmem:[%s465_s7] sm:$0xff] %vm266_vm2, %v260_v32 }
 0x27f   :  { %v262_v34 = vpop.f32.mrf.mxu0 }
 0x280   :  { %v263_v35 = vadd.f32 %v283_v30, %v262_v34 }
 0x281   :  { %v319_v36 = vpop.f32.mrf.mxu0 }
 0x282   :  { %268 = vst.msk [vmem:[%s465_s7 + $0x8] sm:$0xff] %vm266_vm2, %v263_v35 }
 0x283   :  { %273 = vsyncpa [#allocation3], 1 }
 0x284   :  { %274 = vsyncpa [#allocation5], 1 }

</bundles_post_ra>
